<compile_context>
chip_gen: v5e
topology: v5e:2x2
jax: 0.10.0
libtpu: 0.0.40
codegen_flags: <defaults>
</compile_context>

<pallas_src>
import functools
import math

import jax
import jax.numpy as jnp
from jax.experimental import pallas as pl
from jax.experimental.pallas import tpu as pltpu

_EPS = 1e-8          # matches torch.cosine_similarity default eps
_NEG_BIG = -1e30     # finite "-inf" so exp(m_old - m_new) never produces NaN


def _round_up(x, m):
    return ((x + m - 1) // m) * m


# --------------------------------------------------------------------------
# Hardware-aware sizing helpers
# --------------------------------------------------------------------------
def _device_kind():
    try:
        return jax.devices()[0].device_kind.lower()
    except Exception:
        return ""


def _vmem_budget_bytes():
    """Per-TensorCore VMEM budget (75% of physical, headroom for compiler)."""
    cap = 0
    try:
        cap = int(pltpu.get_tpu_info().vmem_capacity_bytes)
    except Exception:
        cap = 0
    if cap <= 0:
        kind = _device_kind()
        cap = (64 if "v7" in kind else 128) * 1024 * 1024
    return (cap * 3) // 4


def _lane_pad():
    """Contraction-axis padding: 256 for the 2x256x256 MXUs (v6e/v7x)."""
    kind = _device_kind()
    return 256 if ("v6" in kind or "v7" in kind) else 128


def _pick_tm_resident(n8, d_pad, itemsize, budget):
    """Row-tile for the resident design, or None if it does not fit."""
    # Resident array: double-buffered input + possible f32 operand copy.
    fixed = 2 * n8 * d_pad * itemsize + n8 * d_pad * 4
    avail = budget - fixed
    if avail <= 0:
        return None
    # Per row of the (TM, N) slab: ~6 f32/i32-sized temporaries (logits, max-
    # masked copy, exp, iota, masks) + the sliced (TM, Dp) row-block value.
    per_row = 6 * n8 * 4 + 2 * d_pad * 4
    tm = (avail // per_row // 8) * 8
    if tm < 8:
        return None
    tm = int(min(tm, n8, 1024))
    if tm >= 256:
        tm = (tm // 256) * 256      # MXU-friendly M tile on v6e/v7x
    return tm


def _pick_tiles_tiled(d_pad, itemsize, budget):
    """(TM, TN) for the column-tiled fallback; TN is a multiple of TM."""
    tm = 256
    while tm > 8 and 2 * tm * d_pad * itemsize > budget // 4:
        tm //= 2
    tm = max(8, tm)
    rem = budget - 2 * tm * d_pad * itemsize
    # Column stream (double-buffered) + its loaded value + (TM, TN) slab temps.
    denom = 2 * d_pad * itemsize + d_pad * 4 + 6 * tm * 4
    tn = max(rem, 0) // denom
    tn = max(tm, (tn // tm) * tm)
    tn = min(tn, 4096)
    return tm, tn


# --------------------------------------------------------------------------
# Kernel 1: resident design -- full scaled (N_pad, D_pad) array lives in VMEM
# (its block index never changes, so it is DMA'd from HBM exactly once); a
# 1-D "parallel" grid streams (TM, N_pad) logit slabs.
# --------------------------------------------------------------------------
def _resident_kernel(x_ref, out_ref, *, batch, n_real, block_rows):
    pid = pl.program_id(0)
    row0 = pl.multiple_of(pid * block_rows, 8)

    xb = x_ref[pl.ds(row0, block_rows), :]                     # (TM, Dp)
    # (TM, N_pad) slab: rows were pre-scaled, so this is cos(x_i,x_j)/tau.
    logits = jax.lax.dot_general(
        xb, x_ref[...],
        dimension_numbers=(((1,), (1,)), ((), ())),
        preferred_element_type=jnp.float32)

    n_pad = logits.shape[1]
    self_col = (jax.lax.broadcasted_iota(jnp.int32, (block_rows, 1), 0)
                + pid * block_rows)
    partner_col = (self_col + batch) % n_real                  # (i + B) mod N
    cols = jax.lax.broadcasted_iota(jnp.int32, (block_rows, n_pad), 1)
    is_partner = cols == partner_col
    excluded = is_partner | (cols == self_col) | (cols >= n_real)

    # Numerator logit = cos(x1x2_i, x2x1_i)/tau read straight off the slab.
    num_logit = jnp.sum(jnp.where(is_partner, logits, 0.0),
                        axis=1, keepdims=True)

    # Per-row max over the NON-excluded columns -> safe exp shift: no
    # overflow (true max) and no underflow at small tau.
    m = jnp.max(jnp.where(excluded, _NEG_BIG, logits), axis=1, keepdims=True)
    den = jnp.sum(jnp.where(excluded, 0.0, jnp.exp(logits - m)),
                  axis=1, keepdims=True)

    contrib = jnp.log(den) + m - num_logit                     # per-row loss
    contrib = jnp.where(self_col < n_real, contrib, 0.0)       # padded rows
    # Lane-dense (1, 8, 128) block store (unmasked vst); wrapper reads [0,0].
    out_ref[...] = jnp.full((1, 8, 128), jnp.sum(contrib), dtype=jnp.float32)


def _resident_call(xs, batch, n_real, tm, n_pad, d_pad, vmem_limit):
    g = n_pad // tm
    kernel = functools.partial(_resident_kernel, batch=batch, n_real=n_real,
                               block_rows=tm)
    cost = pl.CostEstimate(
        flops=2 * n_pad * n_pad * d_pad,
        transcendentals=n_pad * n_pad,
        bytes_accessed=n_pad * d_pad * xs.dtype.itemsize + g * 8 * 128 * 4)
    partials = pl.pallas_call(
        kernel,
        out_shape=jax.ShapeDtypeStruct((g, 8, 128), jnp.float32),
        grid=(g,),
        in_specs=[pl.BlockSpec((n_pad, d_pad), lambda i: (0, 0))],
        out_specs=pl.BlockSpec((1, 8, 128), lambda i: (i, 0, 0)),
        compiler_params=pltpu.CompilerParams(
            dimension_semantics=("parallel",),
            vmem_limit_bytes=int(vmem_limit)),
        cost_estimate=cost,
    )(xs)
    return jnp.sum(partials[:, 0, 0])


# --------------------------------------------------------------------------
# Kernel 2: column-tiled fallback (large N / v7x).  2-D grid, rows parallel,
# columns arbitrary, online max / sum-exp accumulation in VMEM scratch.
# VMEM footprint is O(TM*Dp + TN*Dp + TM*TN) independent of N.
# --------------------------------------------------------------------------
def _tiled_kernel(xr_ref, xc_ref, out_ref, m_sc, l_sc, num_sc,
                  *, batch, n_real, block_rows, block_cols):
    i = pl.program_id(0)
    j = pl.program_id(1)

    @pl.when(j == 0)
    def _():
        m_sc[...] = jnp.full(m_sc.shape, _NEG_BIG, dtype=m_sc.dtype)
        l_sc[...] = jnp.zeros(l_sc.shape, dtype=l_sc.dtype)
        num_sc[...] = jnp.zeros(num_sc.shape, dtype=num_sc.dtype)

    logits = jax.lax.dot_general(
        xr_ref[...], xc_ref[...],
        dimension_numbers=(((1,), (1,)), ((), ())),
        preferred_element_type=jnp.float32)                    # (TM, TN)

    self_col = (jax.lax.broadcasted_iota(jnp.int32, (block_rows, 1), 0)
                + i * block_rows)
    partner_col = (self_col + batch) % n_real
    cols = (jax.lax.broadcasted_iota(jnp.int32, (block_rows, block_cols), 1)
            + j * block_cols)
    is_partner = cols == partner_col
    excluded = is_partner | (cols == self_col) | (cols >= n_real)

    # Numerator is a logit (not exponentiated) -> plain accumulation.
    num_sc[...] += jnp.sum(jnp.where(is_partner, logits, 0.0),
                           axis=1, keepdims=True)

    m_new = jnp.maximum(m_sc[...],
                        jnp.max(jnp.where(excluded, _NEG_BIG, logits),
                                axis=1, keepdims=True))
    scale = jnp.exp(m_sc[...] - m_new)
    e = jnp.where(excluded, 0.0, jnp.exp(logits - m_new))
    l_sc[...] = l_sc[...] * scale + jnp.sum(e, axis=1, keepdims=True)
    m_sc[...] = m_new

    @pl.when(j == pl.num_programs(1) - 1)
    def _():
        contrib = jnp.log(l_sc[...]) + m_sc[...] - num_sc[...]
        contrib = jnp.where(self_col < n_real, contrib, 0.0)
        out_ref[...] = jnp.full((1, 8, 128), jnp.sum(contrib),
                                dtype=jnp.float32)


def _tiled_call(xs, batch, n_real, tm, tn, n_pad, d_pad, vmem_limit):
    gr, gc = n_pad // tm, n_pad // tn
    kernel = functools.partial(_tiled_kernel, batch=batch, n_real=n_real,
                               block_rows=tm, block_cols=tn)
    cost = pl.CostEstimate(
        flops=2 * n_pad * n_pad * d_pad,
        transcendentals=n_pad * n_pad,
        bytes_accessed=(gr + 1) * n_pad * d_pad * xs.dtype.itemsize
                       + gr * 8 * 128 * 4)
    partials = pl.pallas_call(
        kernel,
        out_shape=jax.ShapeDtypeStruct((gr, 8, 128), jnp.float32),
        grid=(gr, gc),
        in_specs=[pl.BlockSpec((tm, d_pad), lambda i, j: (i, 0)),
                  pl.BlockSpec((tn, d_pad), lambda i, j: (j, 0))],
        out_specs=pl.BlockSpec((1, 8, 128), lambda i, j: (i, 0, 0)),
        scratch_shapes=[pltpu.VMEM((tm, 1), jnp.float32),   # running max
                        pltpu.VMEM((tm, 1), jnp.float32),   # running sum-exp
                        pltpu.VMEM((tm, 1), jnp.float32)],  # numerator logit
        compiler_params=pltpu.CompilerParams(
            dimension_semantics=("parallel", "arbitrary"),
            vmem_limit_bytes=int(vmem_limit)),
        cost_estimate=cost,
    )(xs, xs)
    return jnp.sum(partials[:, 0, 0])


# --------------------------------------------------------------------------
# Wrapper
# --------------------------------------------------------------------------
def contrastive_loss(x1, x2, tau=0.1, *, mxu_dtype=None, force_tiled=False,
                     block_rows=None, block_cols=None):
    """Pallas equivalent of ContrastiveLoss.forward(x1, x2, tau) -> scalar."""
    assert x1.shape == x2.shape and x1.ndim == 2
    b, d = x1.shape
    n = 2 * b

    # Single concat; x2x1 is never materialized -- the positive-pair logit of
    # row i is column (i + B) mod N of the Gram matrix.
    x12 = jnp.concatenate([x1, x2], axis=0).astype(jnp.float32)

    # Fold tau and the cosine normalization into the rows ONCE (tiny XLA op):
    # xs[i] = x12[i] * rsqrt(tau) / max(||x12[i]||, eps)  =>  xs @ xs.T is
    # exactly cos(x_i, x_j) / tau.
    rsqrt_tau = 1.0 / math.sqrt(float(tau))
    norms = jnp.sqrt(jnp.sum(x12 * x12, axis=1, keepdims=True))
    xs = x12 * (rsqrt_tau / jnp.maximum(norms, _EPS))
    if mxu_dtype is not None:
        # Optional bf16 MXU operands (f32 accumulation); scaling stays in f32.
        xs = xs.astype(mxu_dtype)

    lane = _lane_pad()                       # 256 on v6e/v7x, else 128
    d_pad = _round_up(d, lane)               # zero pad: dots/norms unchanged
    itemsize = jnp.dtype(xs.dtype).itemsize
    budget = _vmem_budget_bytes()
    n8 = _round_up(n, 8)

    if force_tiled:
        tm_res = None
    elif block_rows is not None:
        tm_res = int(block_rows)
    else:
        tm_res = _pick_tm_resident(n8, d_pad, itemsize, budget)
        if tm_res is not None and tm_res < min(64, n8):
            tm_res = None                    # resident slab too small -> tile

    if tm_res is not None:
        assert tm_res % 8 == 0
        n_pad = _round_up(n, tm_res)         # grid divides exactly; padded
        xs_p = jnp.pad(xs, ((0, n_pad - n), (0, d_pad - d)))
        total = _resident_call(xs_p, b, n, tm_res, n_pad, d_pad, budget)
    else:
        if block_rows is not None and block_cols is not None:
            tm, tn = int(block_rows), int(block_cols)
        else:
            tm, tn = _pick_tiles_tiled(d_pad, itemsize, budget)
            tm = min(tm, n8)
            tn = min(tn, _round_up(n8, tm))
        assert tm % 8 == 0 and tn % tm == 0
        n_pad = _round_up(n, tn)
        xs_p = jnp.pad(xs, ((0, n_pad - n), (0, d_pad - d)))
        total = _tiled_call(xs_p, b, n, tm, tn, n_pad, d_pad, budget)

    return total / n


# --------------------------------------------------------------------------
# Pure-JAX reference mirroring the PyTorch module (for correctness check).
# --------------------------------------------------------------------------
def _reference(x1, x2, tau=0.1):
    x1x2 = jnp.concatenate([x1, x2], axis=0)
    x2x1 = jnp.concatenate([x2, x1], axis=0)
    b = x1.shape[0]

    def cos(a, bb, axis):
        na = jnp.maximum(jnp.linalg.norm(a, axis=axis), _EPS)
        nb = jnp.maximum(jnp.linalg.norm(bb, axis=axis), _EPS)
        return jnp.sum(a * bb, axis=axis) / (na * nb)

    cosine_mat = cos(x1x2[:, None, :], x1x2[None, :, :], axis=2) / tau
    eye = jnp.eye(b)
    mask = 1.0 - jnp.concatenate(
        [jnp.concatenate([eye, eye], axis=0)] * 2, axis=1)
    numerators = jnp.exp(cos(x1x2, x2x1, axis=1) / tau)
    denominators = jnp.sum(jnp.exp(cosine_mat) * mask, axis=1)
    return -jnp.mean(jnp.log(numerators / denominators))


if __name__ == "__main__":
    key = jax.random.PRNGKey(0)
    k1, k2, k3, k4 = jax.random.split(key, 4)

    # Primary small shape (resident path, single block).
    B, D = 4, 32
    x1 = jax.random.normal(k1, (B, D), dtype=jnp.float32)
    x2 = jax.random.normal(k2, (B, D), dtype=jnp.float32)
    loss = jax.block_until_ready(contrastive_loss(x1, x2, tau=0.1))
    ref = jax.block_until_ready(_reference(x1, x2, tau=0.1))
    assert jnp.isfinite(loss), "non-finite loss"
    assert jnp.allclose(loss, ref, rtol=1e-4, atol=1e-4), (loss, ref)

    # Multi-block resident path + smaller tau (exercises the per-row max shift).
    B2, D2 = 16, 64
    y1 = jax.random.normal(k3, (B2, D2), dtype=jnp.float32)
    y2 = jax.random.normal(k4, (B2, D2), dtype=jnp.float32)
    ref2 = jax.block_until_ready(_reference(y1, y2, tau=0.05))
    loss_r = jax.block_until_ready(
        contrastive_loss(y1, y2, tau=0.05, block_rows=8))
    assert jnp.allclose(loss_r, ref2, rtol=1e-4, atol=1e-4), (loss_r, ref2)

    # Column-tiled fallback (multiple column steps -> online accumulation).
    loss_t = jax.block_until_ready(
        contrastive_loss(y1, y2, tau=0.05, force_tiled=True,
                         block_rows=8, block_cols=16))
    assert jnp.allclose(loss_t, ref2, rtol=1e-4, atol=1e-4), (loss_t, ref2)

    print("KERNEL_OK")
</pallas_src>

<mosaic_0001>
module attributes {stable_mosaic.version = 11 : i64} {
  func.func @_resident_kernel(%arg0: i32, %arg1: memref<8x128xf32, #tpu.memory_space<vmem>>, %arg2: memref<1x8x128xf32, #tpu.memory_space<vmem>>) attributes {dimension_semantics = [#tpu.dimension_semantics<parallel>], iteration_bounds = array<i64: 1>, scalar_prefetch = 0 : i64, scratch_operands = 0 : i64, tpu.core_type = #tpu.core_type<tc>, window_params = [{pipeline_mode = #tpu.pipeline_mode<synchronous>, transform_indices = @transform_0, window_bounds = array<i64: 8, 128>}, {transform_indices = @transform_1, window_bounds = array<i64: 1, 8, 128>}]} {
    %c8_i32 = arith.constant 8 : i32
    %0 = arith.muli %arg0, %c8_i32 : i32
    %1 = tpu.assume_multiple %0, 8 : i32
    %2 = arith.index_cast %1 : i32 to index
    %c0 = arith.constant 0 : index
    %3 = vector.load %arg1[%2, %c0] : memref<8x128xf32, #tpu.memory_space<vmem>>, vector<8x128xf32>
    %c0_0 = arith.constant 0 : index
    %c0_1 = arith.constant 0 : index
    %4 = vector.load %arg1[%c0_0, %c0_1] : memref<8x128xf32, #tpu.memory_space<vmem>>, vector<8x128xf32>
    %cst = arith.constant dense<0.000000e+00> : vector<8x8xf32>
    %5 = tpu.matmul %3, %4, %cst {dimension_numbers = #tpu.dot_dimension_numbers<[1], [1], [0], [0], [0, 0, 1, 0], [], []>} : vector<8x128xf32>, vector<8x128xf32>, vector<8x8xf32> -> vector<8x8xf32>
    %6 = tpu.iota {dimensions = array<i32: 0>} : vector<8x1xi32>
    %c8_i32_2 = arith.constant 8 : i32
    %7 = arith.muli %arg0, %c8_i32_2 : i32
    %8 = vector.broadcast %7 : i32 to vector<8x1xi32>
    %9 = arith.addi %6, %8 : vector<8x1xi32>
    %c4_i32 = arith.constant 4 : i32
    %10 = vector.broadcast %c4_i32 : i32 to vector<8x1xi32>
    %11 = arith.addi %9, %10 : vector<8x1xi32>
    %c8_i32_3 = arith.constant 8 : i32
    %c0_i32 = arith.constant 0 : i32
    %12 = arith.cmpi eq, %c8_i32_3, %c0_i32 : i32
    %c1_i32 = arith.constant 1 : i32
    %13 = arith.select %12, %c1_i32, %c8_i32_3 : i32
    %14 = vector.broadcast %13 : i32 to vector<8x1xi32>
    %15 = arith.remsi %11, %14 : vector<8x1xi32>
    %c0_i32_4 = arith.constant 0 : i32
    %16 = vector.broadcast %c0_i32_4 : i32 to vector<8x1xi32>
    %17 = arith.cmpi ne, %15, %16 : vector<8x1xi32>
    %c0_i32_5 = arith.constant 0 : i32
    %18 = vector.broadcast %c0_i32_5 : i32 to vector<8x1xi32>
    %19 = arith.cmpi slt, %15, %18 : vector<8x1xi32>
    %c0_i32_6 = arith.constant 0 : i32
    %20 = arith.cmpi slt, %13, %c0_i32_6 : i32
    %21 = vector.broadcast %20 : i1 to vector<8x1xi1>
    %22 = vector.broadcast %21 : vector<8x1xi1> to vector<8x1xi1>
    %23 = arith.xori %19, %22 : vector<8x1xi1>
    %24 = arith.andi %23, %17 : vector<8x1xi1>
    %25 = vector.broadcast %13 : i32 to vector<8x1xi32>
    %26 = arith.addi %15, %25 : vector<8x1xi32>
    %27 = arith.select %24, %26, %15 : vector<8x1xi1>, vector<8x1xi32>
    %28 = tpu.iota {dimensions = array<i32: 1>} : vector<8x8xi32>
    %29 = vector.broadcast %27 : vector<8x1xi32> to vector<8x8xi32>
    %30 = arith.cmpi eq, %28, %29 : vector<8x8xi32>
    %31 = vector.broadcast %9 : vector<8x1xi32> to vector<8x8xi32>
    %32 = arith.cmpi eq, %28, %31 : vector<8x8xi32>
    %33 = arith.ori %30, %32 : vector<8x8xi1>
    %c8_i32_7 = arith.constant 8 : i32
    %34 = vector.broadcast %c8_i32_7 : i32 to vector<8x8xi32>
    %35 = arith.cmpi sge, %28, %34 : vector<8x8xi32>
    %36 = arith.ori %33, %35 : vector<8x8xi1>
    %cst_8 = arith.constant 0.000000e+00 : f32
    %37 = vector.broadcast %cst_8 : f32 to vector<8x8xf32>
    %38 = arith.select %30, %5, %37 : vector<8x8xi1>, vector<8x8xf32>
    %cst_9 = arith.constant dense<0.000000e+00> : vector<8xf32>
    %39 = vector.multi_reduction <add>, %38, %cst_9 [1] : vector<8x8xf32> to vector<8xf32>
    %40 = vector.shape_cast %39 : vector<8xf32> to vector<8x1xf32>
    %cst_10 = arith.constant -1.000000e+30 : f32
    %41 = vector.broadcast %cst_10 : f32 to vector<8x8xf32>
    %42 = arith.select %36, %41, %5 : vector<8x8xi1>, vector<8x8xf32>
    %cst_11 = arith.constant dense<0xFF800000> : vector<8xf32>
    %43 = vector.multi_reduction <maximumf>, %42, %cst_11 [1] : vector<8x8xf32> to vector<8xf32>
    %44 = vector.shape_cast %43 : vector<8xf32> to vector<8x1xf32>
    %45 = vector.broadcast %44 : vector<8x1xf32> to vector<8x8xf32>
    %46 = arith.subf %5, %45 : vector<8x8xf32>
    %47 = math.exp %46 : vector<8x8xf32>
    %cst_12 = arith.constant 0.000000e+00 : f32
    %48 = vector.broadcast %cst_12 : f32 to vector<8x8xf32>
    %49 = arith.select %36, %48, %47 : vector<8x8xi1>, vector<8x8xf32>
    %cst_13 = arith.constant dense<0.000000e+00> : vector<8xf32>
    %50 = vector.multi_reduction <add>, %49, %cst_13 [1] : vector<8x8xf32> to vector<8xf32>
    %51 = vector.shape_cast %50 : vector<8xf32> to vector<8x1xf32>
    %52 = math.log %51 : vector<8x1xf32>
    %53 = arith.addf %52, %44 : vector<8x1xf32>
    %54 = arith.subf %53, %40 : vector<8x1xf32>
    %c8_i32_14 = arith.constant 8 : i32
    %55 = vector.broadcast %c8_i32_14 : i32 to vector<8x1xi32>
    %56 = arith.cmpi slt, %9, %55 : vector<8x1xi32>
    %cst_15 = arith.constant 0.000000e+00 : f32
    %57 = vector.broadcast %cst_15 : f32 to vector<8x1xf32>
    %58 = arith.select %56, %54, %57 : vector<8x1xi1>, vector<8x1xf32>
    %59 = vector.shape_cast %58 : vector<8x1xf32> to vector<1x8x1xf32>
    %cst_16 = arith.constant dense<0.000000e+00> : vector<1xf32>
    %60 = vector.multi_reduction <add>, %59, %cst_16 [1, 2] : vector<1x8x1xf32> to vector<1xf32>
    %61 = vector.shape_cast %60 : vector<1xf32> to vector<1x1x1xf32>
    %62 = vector.extract %61[0, 0, 0] : f32 from vector<1x1x1xf32>
    %63 = vector.broadcast %62 : f32 to vector<1x8x128xf32>
    %c0_17 = arith.constant 0 : index
    %c0_18 = arith.constant 0 : index
    %c0_19 = arith.constant 0 : index
    %64 = vector.load %arg2[%c0_17, %c0_18, %c0_19] : memref<1x8x128xf32, #tpu.memory_space<vmem>>, vector<1x8x128xf32>
    tpu.vector_store %arg2[%c0_17, %c0_18, %c0_19], %63 {strides = array<i32>} : memref<1x8x128xf32, #tpu.memory_space<vmem>>, vector<1x8x128xf32>,
    return
  }
  func.func @transform_0(%arg0: i32) -> (i32, i32) {
    %c0_i32 = arith.constant 0 : i32
    %c0_i32_0 = arith.constant 0 : i32
    %c0_i32_1 = arith.constant 0 : i32
    return %c0_i32, %c0_i32_0 : i32, i32
  }
  func.func @transform_1(%arg0: i32) -> (i32, i32, i32) {
    %c0_i32 = arith.constant 0 : i32
    %c0_i32_0 = arith.constant 0 : i32
    %c0_i32_1 = arith.constant 0 : i32
    return %arg0, %c0_i32, %c0_i32_0 : i32, i32, i32
  }
}

</mosaic_0001>

<bundles_post_ra>
// kernel: tpu_custom_call.1
= control target key start
LH: loop header
LB: loop body
LE: loop exit
PB: predicated region body
PF: predicated region fallthrough
CT: control target
= control target key end

     0   :  { %6 = vsyncpa [#allocation3], 0  ;;  %s209_s0 = inlined_call_operand.hbm [shape: f32[8,128], index: 0, kind: input, shape index: {}]   ;;  %s210_s1 = inlined_call_operand.hbm [shape: f32[1,8,128], index: 1, kind: output, shape index: {}]  }
   0x1   :  { %7 = vsyncpa [#allocation4], 0  ;;  %s13_s8 = sshll.u32 %s209_s0, 4  ;;  %s183_s9 = smov [#allocation2]   ;;  %s14_s8 = int_to_ptr.hbm [resolvable:$true] %s13_s8 }
   0x2   :  { %s15_s10 = sshll.u32 %s183_s9, 4  ;;  %s16_s10 = int_to_ptr.vmem [resolvable:$true] %s15_s10 }
   0x3   :  { %18 = dma.hbm_to_vmem [thread:$0]  %s14_s8, 128, %s16_s10, [#allocation3]  }
   0x4   :  { %179 = dma.done.wait [#allocation3], 128  }
   0x5   :  { %180 = vsyncadd [#allocation3], 4294967168  ;;  %v26_v0 = vld [vmem:[#allocation2] sm:$0xff]  ;;  %v47_v1 = vlaneseq  ;;  %vm72_vm5 = vcmask 64512   ;;  %vm93_vm6 = vcmask 7168   ;;  %s184_s0 = smov [#allocation5]  }
   0x6   :  { %42 = vmatpush.xpose.msra.mxu0 %v26_v0  ;;  %s111_s11 = sshll.u32 %s184_s0, 4  ;;  %s113_s14 = sshll.u32 %s210_s1, 4  ;;  %s112_s11 = int_to_ptr.vmem [resolvable:$true] %s111_s11  ;;  %s114_s14 = int_to_ptr.hbm [resolvable:$true] %s113_s14 }
   0x7   :  { %v48_v2 = vshrl.u32 %v47_v1, 7  ;;  %v65_v5 = vand.u32 127, %v47_v1 }
   0x9   :  { %43 = vmatmul.f32.vlgmr.msra.gmra.mxu0 %v26_v0  ;;  %v51_v3 = vadd.s32 4, %v48_v2  ;;  %vm67_vm1 = vcmp.eq.s32.totalorder %v65_v5, %v48_v2  ;;  %vm69_vm3 = vcmp.ge.s32.totalorder %v65_v5, 8 }
   0xb   :  { %v56_v4 = vand.u32 7, %v51_v3 }
   0xd   :  { %vm66_vm0 = vcmp.eq.s32.totalorder %v65_v5, %v56_v4 }
   0xe   :  { %vm68_vm2 = vmor %vm66_vm0, %vm67_vm1 }
   0xf   :  { %vm198_vm4 = vmor %vm68_vm2, %vm69_vm3 }
  0x86   :  { %v44_v7 = vpop.f32.mrf.mxu0 }
  0x87   :  { %v76_v8 = vsel %vm198_vm4, -1e+30, %v44_v7  ;;  %v71_v9 = vsel %vm66_vm0, %v44_v7, 0.0 }
  0x88   :  { %v77_v10 = vsel %vm72_vm5, %v76_v8, -inf  ;;  %v73_v11 = vsel %vm72_vm5, %v71_v9, 0.0 }
  0x89   :  { %78 = vmax.xlane.f32.xlu0 %v77_v10  ;;  %74 = vadd.xlane.f32.xlu1 %v73_v11 }
  0xfc   :  { %v79_v12 = vpop.xlane.xlu0 %78  ;;  %v75_v22 = vpop.xlane.xlu1 %74 }
  0xfd   :  { %v80_v13 = vsub.f32 %v44_v7, %v79_v12 }
  0xff   :  { %v81_v14 = vmul.f32 1.442695, %v80_v13 }
 0x101   :  { %127 = vpow2.f32 %v81_v14 }
 0x107   :  { %v128_v15 = vpop.eup %127 }
 0x108   :  { %v83_v16 = vsel %vm198_vm4, 0.0, %v128_v15 }
 0x109   :  { %v84_v17 = vsel %vm72_vm5, %v83_v16, 0.0 }
 0x10a   :  { %85 = vadd.xlane.f32.xlu0 %v84_v17 }
 0x17d   :  { %v86_v18 = vpop.xlane.xlu0 %85 }
 0x17e   :  { %129 = vlog2.f32 %v86_v18 }
 0x184   :  { %v130_v19 = vpop.eup %129 }
 0x185   :  { %v88_v20 = vmul.f32 0.6931472, %v130_v19 }
 0x187   :  { %v89_v21 = vadd.f32 %v88_v20, %v79_v12 }
 0x189   :  { %v90_v23 = vsub.f32 %v89_v21, %v75_v22 }
 0x18b   :  { %v94_v24 = vsel %vm93_vm6, %v90_v23, 0.0 }
 0x18c   :  { %95 = vadd.xlane.f32.xlu1 %v94_v24 }
 0x1ff   :  { %v96_v25 = vpop.xlane.xlu1 %95 }
 0x200   :  { %v97_v26 = vrot.slane %v96_v25, 4 }
 0x202   :  { %v98_v27 = vadd.f32 %v97_v26, %v96_v25 }
 0x204   :  { %v99_v28 = vrot.slane %v98_v27, 2 }
 0x206   :  { %v100_v29 = vadd.f32 %v99_v28, %v98_v27 }
 0x208   :  { %v101_v30 = vrot.slane %v100_v29, 1 }
 0x20a   :  { %v102_v31 = vadd.f32 %v101_v30, %v100_v29 }
 0x20c   :  { %123 = vpush %v102_v31 }
 0x23d   :  { %s124_s15 = spop %123 }
 0x23e   :  { %v104_v32 = vstv %s124_s15 }
 0x23f   :  { %105 = vst [vmem:[#allocation5] sm:$0xff] %v104_v32 }
 0x240   :  { %116 = dma.vmem_to_hbm [thread:$0]  %s112_s11, 128, %s114_s14, [#allocation4]  }
 0x241   :  { %181 = dma.done.wait [#allocation4], 128  }
 0x242   :  { %182 = vsyncadd [#allocation4], 4294967168 }
 0x243   :  { %121 = vsyncpa [#allocation3], 1 }
 0x244   :  { %122 = vsyncpa [#allocation4], 1 }

</bundles_post_ra>
